<compile_context>
chip_gen: v7x
topology: tpu7x:2x2x1
jax: 0.10.0
libtpu: 0.0.40
codegen_flags: <defaults>
</compile_context>

<pallas_src>
import jax
import jax.numpy as jnp
from jax.experimental import pallas as pl
from jax.experimental.pallas import tpu as pltpu


def _unembed_transpose_kernel(x_ref, o_ref):
    # x_ref: (TL, C) VMEM tile ; o_ref: (C, TL) VMEM tile. Zero FLOPs; HBM-bound.
    o_ref[...] = jnp.swapaxes(x_ref[...], 0, 1)


def _pick_tile_l(L, C, itemsize, vmem_budget_bytes):
    """Return (TL, L_pad).

    TL is the L-tile length: the largest size whose double-buffered in+out tiles
    (4 * TL * C * itemsize bytes) fit the VMEM budget, capped at 8192. Preference
    order: full L (single block), then a 128-multiple divisor of L (no padding,
    no masked stores), then a 128-multiple with <=3% padding, then minimal padding.
    L_pad >= L is the padded extent the kernel actually runs over.
    """
    cap_elems = max(1, vmem_budget_bytes // (4 * C * itemsize))
    cap_elems = min(cap_elems, 8192)
    if L <= cap_elems:
        # Block == full extent along L: satisfies the (8,128) rule regardless of L.
        return L, L

    cap128 = max(128, (cap_elems // 128) * 128)
    best_min_pad = None   # (l_pad, tl) with smallest l_pad
    best_ok = None        # largest tl with padding <= 3%
    tl = cap128
    while tl >= 128:
        if L % tl == 0:
            return tl, L                      # exact divisor: best case
        l_pad = ((L + tl - 1) // tl) * tl
        if best_min_pad is None or l_pad < best_min_pad[0]:
            best_min_pad = (l_pad, tl)
        if best_ok is None and l_pad * 100 <= L * 103:
            best_ok = (l_pad, tl)
        tl -= 128
    l_pad, tl = best_ok if best_ok is not None else best_min_pad
    return tl, l_pad


def patch_unembed_3d(x, x_size, embed_dim, *, use_pallas=None,
                     vmem_budget_bytes=16 * 1024 * 1024):
    """PatchUnEmbed3D.forward: x (B, L, C) -> (B, C, D, H, W)."""
    B, L, C = x.shape
    D, H, W = x_size
    assert C == embed_dim
    assert L == D * H * W

    itemsize = jnp.dtype(x.dtype).itemsize

    if use_pallas is None:
        # Small-input fast path: launch + pipeline warmup dominates tiny transposes.
        use_pallas = B * L * C * itemsize >= (1 << 20)
    if not use_pallas:
        return jnp.swapaxes(x, 1, 2).reshape(B, C, D, H, W)

    TL, L_pad = _pick_tile_l(L, C, itemsize, vmem_budget_bytes)
    num_l = L_pad // TL

    x_in = x
    if L_pad != L:
        # Pad so every output block's last dim is a full TL (unmasked stores);
        # cropped back below. Costs one extra partial copy only on this fallback.
        x_in = jnp.pad(x, ((0, 0), (0, L_pad - L), (0, 0)))

    live_bytes = 4 * TL * C * itemsize  # 2 buffers x (input tile + output tile)
    vmem_limit = min(max(2 * live_bytes, 8 * 1024 * 1024), 32 * 1024 * 1024)

    grid_spec = pl.GridSpec(
        grid=(B, num_l),
        # Squeezed batch dim: kernel sees clean 2-D tiles. C stays un-tiled.
        in_specs=[pl.BlockSpec((pl.Squeezed(), TL, C), lambda b, l: (b, l, 0))],
        # Output tile (C, TL): last dim is a 128-multiple (or the full L) ->
        # lane-dense unmasked stores on every block.
        out_specs=pl.BlockSpec((pl.Squeezed(), C, TL), lambda b, l: (b, 0, l)),
    )

    x_t = pl.pallas_call(
        _unembed_transpose_kernel,
        out_shape=jax.ShapeDtypeStruct((B, C, L_pad), x.dtype),
        grid_spec=grid_spec,
        compiler_params=pltpu.CompilerParams(
            dimension_semantics=("parallel", "parallel"),
            vmem_limit_bytes=vmem_limit,
        ),
        cost_estimate=pl.CostEstimate(
            flops=0,
            transcendentals=0,
            bytes_accessed=2 * B * L_pad * C * itemsize,  # read once + write once
        ),
    )(x_in)

    if L_pad != L:
        x_t = x_t[:, :, :L]

    # Pure-metadata reshape (no extra data movement).
    return x_t.reshape(B, C, D, H, W)


def patch_unembed_3d_ndhwc(x, x_size):
    """Structural alternative (recommended): keep channels-last.

    (B, L, C) -> (B, D, H, W, C) is metadata-only; run the downstream Conv3d with
    NDHWC dimension_numbers and the whole HBM round trip of the transpose vanishes.
    """
    B, L, C = x.shape
    D, H, W = x_size
    return x.reshape(B, D, H, W, C)


def _ref(x, x_size, embed_dim):
    B, L, C = x.shape
    return jnp.swapaxes(x, 1, 2).reshape(B, embed_dim, *x_size)


if __name__ == "__main__":
    key = jax.random.PRNGKey(0)

    # 1) Primary Pallas path: B=2, embed_dim=32, x_size=(4, 8, 8) -> L=256
    #    (single full-extent L block per batch).
    B, embed_dim, x_size = 2, 32, (4, 8, 8)
    L = x_size[0] * x_size[1] * x_size[2]
    k0, k1, k2, k3 = jax.random.split(key, 4)
    x = jax.random.normal(k0, (B, L, embed_dim), dtype=jnp.float32)
    out = jax.block_until_ready(patch_unembed_3d(x, x_size, embed_dim, use_pallas=True))
    assert out.shape == (B, embed_dim, *x_size)
    assert jnp.array_equal(out, _ref(x, x_size, embed_dim))

    # 2) Multi-tile path (tiny budget forces TL=128, 5 tiles, exact divisor).
    x_size2 = (8, 8, 10)
    L2 = x_size2[0] * x_size2[1] * x_size2[2]
    x2 = jax.random.normal(k1, (1, L2, embed_dim), dtype=jnp.float32)
    out2 = jax.block_until_ready(
        patch_unembed_3d(x2, x_size2, embed_dim, use_pallas=True,
                         vmem_budget_bytes=4 * 128 * embed_dim * 4))
    assert jnp.array_equal(out2, _ref(x2, x_size2, embed_dim))

    # 3) Padded fallback path (L=600 not a multiple of 128: pad to 640, crop).
    x_size3 = (5, 10, 12)
    L3 = x_size3[0] * x_size3[1] * x_size3[2]
    x3 = jax.random.normal(k2, (1, L3, embed_dim), dtype=jnp.float32)
    out3 = jax.block_until_ready(
        patch_unembed_3d(x3, x_size3, embed_dim, use_pallas=True,
                         vmem_budget_bytes=4 * 128 * embed_dim * 4))
    assert jnp.array_equal(out3, _ref(x3, x_size3, embed_dim))

    # 4) Non-128 L with a full-extent block (L=105).
    x_size4 = (3, 5, 7)
    L4 = x_size4[0] * x_size4[1] * x_size4[2]
    x4 = jax.random.normal(k3, (2, L4, embed_dim), dtype=jnp.float32)
    out4 = jax.block_until_ready(patch_unembed_3d(x4, x_size4, embed_dim, use_pallas=True))
    assert jnp.array_equal(out4, _ref(x4, x_size4, embed_dim))

    # 5) Small-input fast path (auto-selects the XLA swapaxes route).
    out5 = jax.block_until_ready(patch_unembed_3d(x, x_size, embed_dim))
    assert jnp.array_equal(out5, _ref(x, x_size, embed_dim))

    # 6) Channels-last structural alternative is metadata-only and consistent.
    ndhwc = patch_unembed_3d_ndhwc(x, x_size)
    assert jnp.array_equal(jnp.moveaxis(ndhwc, -1, 1), _ref(x, x_size, embed_dim))

    print("KERNEL_OK")
</pallas_src>

<mosaic_0001>
module attributes {stable_mosaic.version = 11 : i64} {
  func.func @_unembed_transpose_kernel(%arg0: i32, %arg1: i32, %arg2: memref<1x256x32xf32, #tpu.memory_space<vmem>>, %arg3: memref<1x32x256xf32, #tpu.memory_space<vmem>>) attributes {dimension_semantics = [#tpu.dimension_semantics<parallel>, #tpu.dimension_semantics<parallel>], iteration_bounds = array<i64: 2, 1>, scalar_prefetch = 0 : i64, scratch_operands = 0 : i64, tpu.core_type = #tpu.core_type<tc>, window_params = [{transform_indices = @transform_0, window_bounds = array<i64: 1, 256, 32>}, {transform_indices = @transform_1, window_bounds = array<i64: 1, 32, 256>}]} {
    %c0 = arith.constant 0 : index
    %c0_0 = arith.constant 0 : index
    %c0_1 = arith.constant 0 : index
    %0 = vector.load %arg2[%c0, %c0_0, %c0_1] : memref<1x256x32xf32, #tpu.memory_space<vmem>>, vector<1x256x32xf32>
    %1 = vector.shape_cast %0 : vector<1x256x32xf32> to vector<256x32xf32>
    %2 = tpu.transpose %1, [1, 0] : vector<256x32xf32> -> vector<32x256xf32>
    %c0_2 = arith.constant 0 : index
    %c0_3 = arith.constant 0 : index
    %c0_4 = arith.constant 0 : index
    %3 = vector.load %arg3[%c0_2, %c0_3, %c0_4] : memref<1x32x256xf32, #tpu.memory_space<vmem>>, vector<1x32x256xf32>
    %4 = vector.shape_cast %3 : vector<1x32x256xf32> to vector<32x256xf32>
    %5 = vector.shape_cast %2 : vector<32x256xf32> to vector<1x32x256xf32>
    tpu.vector_store %arg3[%c0_2, %c0_3, %c0_4], %5 {strides = array<i32>} : memref<1x32x256xf32, #tpu.memory_space<vmem>>, vector<1x32x256xf32>,
    return
  }
  func.func @transform_0(%arg0: i32, %arg1: i32) -> (i32, i32, i32) {
    %c0_i32 = arith.constant 0 : i32
    %c0_i32_0 = arith.constant 0 : i32
    return %arg0, %arg1, %c0_i32 : i32, i32, i32
  }
  func.func @transform_1(%arg0: i32, %arg1: i32) -> (i32, i32, i32) {
    %c0_i32 = arith.constant 0 : i32
    %c0_i32_0 = arith.constant 0 : i32
    return %arg0, %c0_i32, %arg1 : i32, i32, i32
  }
}

</mosaic_0001>

<bundles_post_ra>
// kernel: tpu_custom_call.1
= control target key start
LH: loop header
LB: loop body
LE: loop exit
PB: predicated region body
PF: predicated region fallthrough
CT: control target
= control target key end

     0   :  { %6 = vsyncpa [#allocation3], 0  ;;  %s659_s0 = inlined_call_operand.vmem [shape: f32[2,256,32], index: 0, kind: input, shape index: {}]   ;;  %s660_s1 = inlined_call_operand.hbm [shape: f32[2,32,256], index: 1, kind: output, shape index: {}]  }
   0x1   :  { %8 = vsyncpa [#allocation3 + $0x1], 0  ;;  %s510_s6 = smov 0   ;;  %s512_s7 = smov 0  }
   0x2   :  { %s514_s8 = smov 0   ;;  %s516_s9 = smov 0  }
   0x3   :  { %s518_s10 = smov 0   ;;  %s520_s11 = smov 0  }
   0x4 LB: > { %s345_s12 = sadd.s32 4294967295, %s495_s11   ;;  %s346_s13 = sadd.s32 4294967294, %s495_s11   ;;  %s495_s11 = sphi %s520_s11, %s14_s11   ;;  %s491_s10 = sphi %s518_s10, %s667_s10   ;;  %s487_s9 = sphi %s516_s9, %s666_s9   ;;  %s483_s8 = sphi %s514_s8, %s665_s8   ;;  %s479_s7 = sphi %s512_s7, %s664_s7   ;;  %s475_s6 = sphi %s510_s6, %s663_s6  }
   0x5   : > { %s26_s14 = sadd.s32 1, %s491_s10  ;;  %s63_s15 = sadd.s32 1, %s483_s8 }
   0x6   : > { %p28_p0 = scmp.ge.s32.totalorder %s26_s14, 2  ;;  %p73_p1 = scmp.ne.s32.totalorder %s483_s8, %s479_s7 }
   0x7   : > { %p74_p2 = scmp.eq.s32.totalorder %s345_s12, 1  ;;  %p79_p3 = scmp.ne.s32.totalorder %s479_s7, %s475_s6 }
   0x8   : > { %s669_s14 = smov (%p28_p0, %s26_s14), 0  ;;  %p80_p5 = scmp.eq.s32.totalorder %s346_s13, 1 }
   0x9   : > { %p550_p4 = por %p74_p2, %p73_p1  ;;  %s58_s17 = ssub.s32 %s491_s10, %s669_s14 }
   0xa   : > { %p349_p6 = scmp.ge.s32.totalorder %s495_s11, 1  ;;  %p61_p7 = scmp.eq.s32.totalorder %s58_s17, 0 }
   0xb   : > { %p557_p8 = por %p80_p5, %p79_p3  ;;  %p111_p9 = scmp.lt.s32.totalorder %s495_s11, 3 }
   0xc   : > { %s563_s19 = scalar_select %p61_p7, %s483_s8, %s63_s15  }
   0xd   : > { %p112_p10 = pnand %p349_p6, %p111_p9 }
   0xe   : > { %p136_p11 = scmp.lt.s32.totalorder (!%p112_p10), %s487_s9, 1  ;;  %s132_s25 = sand.u32 (!%p112_p10), 1, %s479_s7  }
   0xf   : > { %115 = sbr.rel (%p112_p10) target bundleno = 184 (0xb8), region = 24  ;;  %s350_s26 = sshll.u32 (!%p112_p10), %s132_s25, 6 }
  0x10   : > { %s134_s27 = scalar_lea.vmem (!%p112_p10), [#allocation2], %s350_s26  ;;  %s359_s29 = sshll.u32 (!%p112_p10), %s487_s9, 10 }
  0x11   : > { %s266_s28 = sshll.u32 (!%p112_p10), %s134_s27, 4  ;;  %s611_s3 = scalar_lea.hbm (!%p112_p10), %s660_s1, %s359_s29  ;;  %s606_s28 = int_to_ptr.vmem [resolvable:$true] %s266_s28 }
  0x12   : > { %s613_s4 = scalar_lea.sflag (!%p112_p10), [#allocation3], %s132_s25  ;;  %s417_s5 = scalar_lea.vmem (!%p112_p10), %s606_s28, 1024 }
  0x13   : > { %p418_p12 = scmp.ne.s32.totalorder (!%p112_p10), %s606_s28, %s417_s5 }
  0x15   : > { %p419_p13 = pnand (!%p112_p10), %p418_p12, %p550_p4 }
  0x16   : > { %s137_s20 = scalar_select %p136_p11, %s487_s9, 1 }
  0x17   : > { %p420_p0 = pneg %p419_p13  ;;  %s497_s9 = smov [#allocation2]  }
  0x18   : > { %s358_s21 = sshll.u32 %s137_s20, 8  ;;  %s421_s12 = sshll.u32 %s497_s9, 4  ;;  %s422_s12 = int_to_ptr.vmem [resolvable:$false] %s421_s12 }
  0x19   : > { %s570_s24 = scalar_lea.vmem %s659_s0, %s358_s21  ;;  %s423_s13 = scalar_lea.vmem %s422_s12, 2048 }
  0x1a   : > { %v162_v0 = vld [vmem:[%s570_s24 + $0x80] sm:$0xff]  ;;  %v163_v2 = vld [vmem:[%s570_s24 + $0x88] sm:$0xff]  ;;  %v164_v4 = vld [vmem:[%s570_s24 + $0x90] sm:$0xff]  ;;  %p424_p1 = scmp.lt.s32.totalorder %s606_s28, %s422_s12  ;;  %p425_p2 = scmp.lt.s32.totalorder %s423_s13, %s417_s5 }
  0x1b   : > { %v146_v1 = vld [vmem:[%s570_s24] sm:$0xff]  ;;  %210 = vxpose.xlu1.b32.start [1/16] (narrow) %v162_v0, 32  ;;  %v147_v3 = vld [vmem:[%s570_s24 + $0x8] sm:$0xff]  ;;  %v148_v5 = vld [vmem:[%s570_s24 + $0x10] sm:$0xff] }
  0x1c   : > { %178 = vxpose.xlu0.b32.start [1/16] (narrow) %v146_v1, 32  ;;  %v165_v6 = vld [vmem:[%s570_s24 + $0x98] sm:$0xff]  ;;  %v166_v8 = vld [vmem:[%s570_s24 + $0xa0] sm:$0xff]  ;;  %v167_v10 = vld [vmem:[%s570_s24 + $0xa8] sm:$0xff]  ;;  %p426_p3 = por %p425_p2, %p424_p1 }
  0x1d   : > { %v149_v7 = vld [vmem:[%s570_s24 + $0x18] sm:$0xff]  ;;  %v150_v9 = vld [vmem:[%s570_s24 + $0x20] sm:$0xff]  ;;  %v151_v11 = vld [vmem:[%s570_s24 + $0x28] sm:$0xff] }
  0x1e   : > { %v168_v12 = vld [vmem:[%s570_s24 + $0xb0] sm:$0xff]  ;;  %v169_v14 = vld [vmem:[%s570_s24 + $0xb8] sm:$0xff]  ;;  %v170_v16 = vld [vmem:[%s570_s24 + $0xc0] sm:$0xff]  ;;  %p427_p5 = pnand %p426_p3, %p420_p0 }
  0x1f   : > { %211 = vxpose.xlu1.b32.cont [2/16] (narrow) %v163_v2, 32  ;;  %v152_v13 = vld [vmem:[%s570_s24 + $0x30] sm:$0xff]  ;;  %v153_v15 = vld [vmem:[%s570_s24 + $0x38] sm:$0xff]  ;;  %v154_v17 = vld [vmem:[%s570_s24 + $0x40] sm:$0xff] }
  0x20   : > { %179 = vxpose.xlu0.b32.cont [2/16] (narrow) %v147_v3, 32  ;;  %v171_v18 = vld [vmem:[%s570_s24 + $0xc8] sm:$0xff]  ;;  %v172_v20 = vld [vmem:[%s570_s24 + $0xd0] sm:$0xff]  ;;  %v173_v22 = vld [vmem:[%s570_s24 + $0xd8] sm:$0xff] }
  0x21   : > { %v155_v19 = vld [vmem:[%s570_s24 + $0x48] sm:$0xff]  ;;  %v156_v21 = vld [vmem:[%s570_s24 + $0x50] sm:$0xff]  ;;  %v157_v23 = vld [vmem:[%s570_s24 + $0x58] sm:$0xff] }
  0x22   : > { %v174_v24 = vld [vmem:[%s570_s24 + $0xe0] sm:$0xff]  ;;  %v175_v26 = vld [vmem:[%s570_s24 + $0xe8] sm:$0xff]  ;;  %v176_v28 = vld [vmem:[%s570_s24 + $0xf0] sm:$0xff] }
  0x23   : > { %212 = vxpose.xlu1.b32.cont [3/16] (narrow) %v164_v4, 32  ;;  %v158_v25 = vld [vmem:[%s570_s24 + $0x60] sm:$0xff]  ;;  %v159_v27 = vld [vmem:[%s570_s24 + $0x68] sm:$0xff]  ;;  %v160_v29 = vld [vmem:[%s570_s24 + $0x70] sm:$0xff] }
  0x24   : > { %180 = vxpose.xlu0.b32.cont [3/16] (narrow) %v148_v5, 32  ;;  %v177_v30 = vld [vmem:[%s570_s24 + $0xf8] sm:$0xff] }
  0x25   : > { %v161_v31 = vld [vmem:[%s570_s24 + $0x78] sm:$0xff] }
  0x27   : > { %213 = vxpose.xlu1.b32.cont [4/16] (narrow) %v165_v6, 32 }
  0x28   : > { %181 = vxpose.xlu0.b32.cont [4/16] (narrow) %v149_v7, 32 }
  0x2b   : > { %214 = vxpose.xlu1.b32.cont [5/16] (narrow) %v166_v8, 32 }
  0x2c   : > { %182 = vxpose.xlu0.b32.cont [5/16] (narrow) %v150_v9, 32 }
  0x2f   : > { %215 = vxpose.xlu1.b32.cont [6/16] (narrow) %v167_v10, 32 }
  0x30   : > { %183 = vxpose.xlu0.b32.cont [6/16] (narrow) %v151_v11, 32 }
  0x33   : > { %216 = vxpose.xlu1.b32.cont [7/16] (narrow) %v168_v12, 32 }
  0x34   : > { %184 = vxpose.xlu0.b32.cont [7/16] (narrow) %v152_v13, 32 }
  0x37   : > { %217 = vxpose.xlu1.b32.cont [8/16] (narrow) %v169_v14, 32 }
  0x38   : > { %185 = vxpose.xlu0.b32.cont [8/16] (narrow) %v153_v15, 32 }
  0x3b   : > { %218 = vxpose.xlu1.b32.cont [9/16] (narrow) %v170_v16, 32 }
  0x3c   : > { %186 = vxpose.xlu0.b32.cont [9/16] (narrow) %v154_v17, 32 }
  0x3f   : > { %219 = vxpose.xlu1.b32.cont [10/16] (narrow) %v171_v18, 32 }
  0x40   : > { %187 = vxpose.xlu0.b32.cont [10/16] (narrow) %v155_v19, 32 }
  0x43   : > { %220 = vxpose.xlu1.b32.cont [11/16] (narrow) %v172_v20, 32 }
  0x44   : > { %188 = vxpose.xlu0.b32.cont [11/16] (narrow) %v156_v21, 32 }
  0x47   : > { %221 = vxpose.xlu1.b32.cont [12/16] (narrow) %v173_v22, 32 }
  0x48   : > { %189 = vxpose.xlu0.b32.cont [12/16] (narrow) %v157_v23, 32 }
  0x4b   : > { %222 = vxpose.xlu1.b32.cont [13/16] (narrow) %v174_v24, 32 }
  0x4c   : > { %190 = vxpose.xlu0.b32.cont [13/16] (narrow) %v158_v25, 32 }
  0x4f   : > { %223 = vxpose.xlu1.b32.cont [14/16] (narrow) %v175_v26, 32 }
  0x50   : > { %191 = vxpose.xlu0.b32.cont [14/16] (narrow) %v159_v27, 32 }
  0x53   : > { %224 = vxpose.xlu1.b32.cont [15/16] (narrow) %v176_v28, 32 }
  0x54   : > { %192 = vxpose.xlu0.b32.cont [15/16] (narrow) %v160_v29, 32 }
  0x57   : > { %225 = vxpose.xlu1.b32.end [16/16] (narrow) %v177_v30, 32 }
  0x58   : > { %193 = vxpose.xlu0.b32.end [16/16] (narrow) %v161_v31, 32 }
  0x9b   : > { %v226_v32 = vpop.trf.xlu1 }
  0x9c   : > { %v194_v33 = vpop.trf.xlu0  ;;  %243 = vst [vmem:[%s134_s27 + $0x8] sm:$0xff] %v226_v32 }
  0x9d   : > { %242 = vst [vmem:[%s134_s27] sm:$0xff] %v194_v33 }
  0x9f   : > { %v227_v34 = vpop.trf.xlu1 }
  0xa0   : > { %v195_v35 = vpop.trf.xlu0  ;;  %245 = vst [vmem:[%s134_s27 + $0x18] sm:$0xff] %v227_v34 }
  0xa1   : > { %244 = vst [vmem:[%s134_s27 + $0x10] sm:$0xff] %v195_v35 }
  0xa3   : > { %v228_v36 = vpop.trf.xlu1 }
  0xa4   : > { %v196_v37 = vpop.trf.xlu0  ;;  %247 = vst [vmem:[%s134_s27 + $0x28] sm:$0xff] %v228_v36 }
  0xa5   : > { %246 = vst [vmem:[%s134_s27 + $0x20] sm:$0xff] %v196_v37 }
  0xa7   : > { %v229_v38 = vpop.trf.xlu1 }
  0xa8   : > { %v197_v39 = vpop.trf.xlu0  ;;  %249 = vst [vmem:[%s134_s27 + $0x38] sm:$0xff] %v229_v38 }
  0xa9   : > { %248 = vst [vmem:[%s134_s27 + $0x30] sm:$0xff] %v197_v39 }
  0xaa   : > { %430 = shalt.err (!%p427_p5)
}
  0xab   : > { %s431_s15 = scalar_lea.hbm %s611_s3, 1024  ;;  %s435_s21 = scalar_lea.hbm %s660_s1, 2048 }
  0xac   : > { %p432_p6 = scmp.ne.s32.totalorder %s611_s3, %s431_s15  ;;  %p436_p10 = scmp.lt.u32.totalorder %s611_s3, %s660_s1 }
  0xad   : > { %p437_p11 = scmp.lt.u32.totalorder %s435_s21, %s431_s15  ;;  %p439_p13 = scmp.lt.u32.totalorder %s431_s15, %s611_s3 }
  0xae   : > { %p433_p7 = pnand %p432_p6, %p550_p4 }
  0xaf   : > { %p438_p12 = por %p437_p11, %p436_p10 }
  0xb0   : > { %p434_p9 = pneg %p433_p7 }
  0xb1   : > { %p440_p0 = por %p439_p13, %p438_p12 }
  0xb3   : > { %p441_p1 = pnand %p440_p0, %p434_p9 }
  0xb5   : > { %444 = shalt.err (!%p441_p1)
}
  0xb6   : > { %s498_s24 = smov 256   ;;  %s499_s25 = smov 16  }
  0xb7   : > { %360 = dma.vmem_to_hbm [thread:$0]  (%p550_p4), %s606_s28, 1024, %s611_s3, %s613_s4, %s498_s24, %s498_s24, %s499_s25  }
  0xb8 PF: > { %p366_p2 = scmp.ge.s32.totalorder %s495_s11, 2  ;;  %s281_s26 = sand.u32 1, %s475_s6  }
  0xb9   : > { %s282_s27 = scalar_lea.sflag [#allocation3], %s281_s26 }
  0xba   : > { %p363_p3 = pnand %p366_p2, %p557_p8 }
  0xbc   : > { %470 = dma.done.wait (!%p363_p3), %s282_s27, 1024  }
  0xbd   : > { %472 = vsyncadd (!%p363_p3), %s282_s27, 4294966272  ;;  %s14_s11 = sadd.s32 1, %s495_s11   ;;  %s663_s6 = smov %s479_s7 }
  0xbe   : > { %p11_p5 = scmp.ge.s32.totalorder %s14_s11, 4   ;;  %s664_s7 = smov %s483_s8 }
  0xbf   : > { %s665_s8 = smov %s563_s19  ;;  %s666_s9 = smov %s491_s10 }
  0xc0   : > { %s667_s10 = smov %s669_s14  ;;  %13 = sbr.rel (!%p11_p5) target bundleno = 4 (0x4), region = 59 }
  0xc7   :  { %287 = vsyncpa [#allocation3], 1 }
  0xc8   :  { %289 = vsyncpa [#allocation3 + $0x1], 1 }

</bundles_post_ra>
